<compile_context>
chip_gen: v7x
topology: tpu7x:2x2x1
jax: 0.10.0
libtpu: 0.0.40
codegen_flags: <defaults>
</compile_context>

<pallas_src>
import jax
import jax.numpy as jnp
from jax.experimental import pallas as pl
from jax.experimental.pallas import tpu as pltpu

EPS = 0.1  # GIN (1 + eps) center-node weighting, fixed deterministically


def robust_classifier_kernel(x_ref, adj_ref, pool_ref, w1_ref, b1_ref,
                             w2_ref, b2_ref, wc_ref, bc_ref, logits_ref):
    """Single invocation: all S subgraphs fused.

    x_ref:    (S*N, D)   flattened node features
    adj_ref:  (S*N, S*N) block-diagonal adjacency with (1+eps)*I folded in
    pool_ref: (S, S*N)   mean-pool matrix (1/N within each subgraph's block)
    """
    x = x_ref[...]

    # GIN aggregation + center-node term in ONE MXU issue:
    # (A_blockdiag + (1+eps) I) @ X  ==  per-subgraph (1+eps)*X_s + A_s @ X_s stacked.
    h0 = jnp.dot(adj_ref[...], x, preferred_element_type=jnp.float32)

    # 2-layer MLP with ReLU on the (S*N, .) slab.
    h1 = jnp.maximum(
        jnp.dot(h0, w1_ref[...], preferred_element_type=jnp.float32) + b1_ref[...], 0.0)
    h2 = jnp.maximum(
        jnp.dot(h1, w2_ref[...], preferred_element_type=jnp.float32) + b2_ref[...], 0.0)

    # Mean graph pooling as a matmul: (S, S*N) @ (S*N, H) -> (S, H)
    g = jnp.dot(pool_ref[...], h2, preferred_element_type=jnp.float32)

    # Final linear classifier -> (S, C), single store + writeback.
    logits_ref[...] = (
        jnp.dot(g, wc_ref[...], preferred_element_type=jnp.float32) + bc_ref[...])


def robust_classifier_forward(x, adj, w1, b1, w2, b2, wc, bc):
    """Runs the BaseClassifier on all S subgraphs (fused) and majority-votes.

    Args:
      x:   [S, N, D] float32 node features per subgraph
      adj: [S, N, N] float32 dense adjacency per subgraph
      weights: GIN-MLP + classifier parameters
    Returns:
      (vote_label, logits[S, C], vote_counts[C])
    """
    S, N, D = x.shape
    H = w1.shape[1]
    C = wc.shape[1]
    SN = S * N

    # Layout plumbing in glue (not compute): flatten features, build the
    # block-diagonal adjacency (with the GIN self term folded in) and the
    # mean-pool matrix.
    x_flat = x.reshape(SN, D)
    eye_s = jnp.eye(S, dtype=adj.dtype)
    adj_bd = jnp.einsum("sij,st->sitj", adj, eye_s).reshape(SN, SN)
    adj_bd = adj_bd + (1.0 + EPS) * jnp.eye(SN, dtype=adj.dtype)
    pool = jnp.repeat(eye_s, N, axis=1) / jnp.float32(N)          # (S, S*N)

    full2 = lambda shape: pl.BlockSpec(shape, lambda i: (0, 0))

    logits = pl.pallas_call(
        robust_classifier_kernel,
        out_shape=jax.ShapeDtypeStruct((S, C), jnp.float32),
        grid=(1,),
        in_specs=[
            full2((SN, D)),     # x (flattened)
            full2((SN, SN)),    # block-diagonal adjacency (+ (1+eps) I)
            full2((S, SN)),     # pooling matrix
            full2((D, H)),      # w1
            full2((1, H)),      # b1
            full2((H, H)),      # w2
            full2((1, H)),      # b2
            full2((H, C)),      # wc
            full2((1, C)),      # bc
        ],
        out_specs=full2((S, C)),
        compiler_params=pltpu.CompilerParams(
            dimension_semantics=("arbitrary",)),
    )(x_flat, adj_bd, pool, w1, b1, w2, b2, wc, bc)

    # Majority vote in glue (trivial scalar work, matches np.argmax/np.bincount).
    labels = jnp.argmax(logits, axis=1)
    counts = jnp.sum(jax.nn.one_hot(labels, C, dtype=jnp.int32), axis=0)
    vote_label = jnp.argmax(counts)
    return vote_label, logits, counts


def _make_params(key, D, H, C):
    k1, k2, k3 = jax.random.split(key, 3)
    w1 = jax.random.normal(k1, (D, H), jnp.float32) * 0.1
    b1 = jnp.zeros((1, H), jnp.float32)
    w2 = jax.random.normal(k2, (H, H), jnp.float32) * 0.1
    b2 = jnp.zeros((1, H), jnp.float32)
    wc = jax.random.normal(k3, (H, C), jnp.float32) * 0.1
    bc = jnp.zeros((1, C), jnp.float32)
    return w1, b1, w2, b2, wc, bc


def _make_subgraphs(key, S, N, D):
    """Emulates Hasher.generate_mixed_subgraphs: S subgraphs sharing a base graph
    with deterministically dropped edges."""
    kx, ka, kd = jax.random.split(key, 3)
    base_x = jax.random.normal(kx, (N, D), jnp.float32)
    base_adj = (jax.random.uniform(ka, (N, N)) < 0.3).astype(jnp.float32)
    base_adj = jnp.maximum(base_adj, base_adj.T)          # symmetric
    base_adj = base_adj * (1.0 - jnp.eye(N))              # no self loops
    keep = (jax.random.uniform(kd, (S, N, N)) < 0.7).astype(jnp.float32)
    keep = jnp.minimum(keep, jnp.transpose(keep, (0, 2, 1)))
    adj = base_adj[None] * keep                            # [S, N, N]
    x = jnp.broadcast_to(base_x, (S, N, D))                # [S, N, D]
    return x, adj


def _reference(x, adj, w1, b1, w2, b2, wc, bc):
    # Matches the PyTorch BaseClassifier math: GIN aggregation -> MLP -> mean pool
    # -> linear classifier -> per-subgraph argmax -> majority vote.
    agg = jnp.einsum("snm,smd->snd", adj, x)
    h0 = (1.0 + EPS) * x + agg
    h1 = jnp.maximum(jnp.einsum("snd,dh->snh", h0, w1) + b1, 0.0)
    h2 = jnp.maximum(jnp.einsum("snh,hk->snk", h1, w2) + b2, 0.0)
    g = jnp.mean(h2, axis=1)
    logits = g @ wc + bc
    labels = jnp.argmax(logits, axis=1)
    counts = jnp.sum(jax.nn.one_hot(labels, wc.shape[1], dtype=jnp.int32), axis=0)
    return jnp.argmax(counts), logits, counts


if __name__ == "__main__":
    S, N, D, H, C = 8, 16, 32, 64, 8   # subgraphs, nodes, in-dim, hidden, classes

    key = jax.random.PRNGKey(0)
    k_params, k_graph = jax.random.split(key)
    w1, b1, w2, b2, wc, bc = _make_params(k_params, D, H, C)
    x, adj = _make_subgraphs(k_graph, S, N, D)

    vote_label, logits, counts = robust_classifier_forward(
        x, adj, w1, b1, w2, b2, wc, bc)
    jax.block_until_ready((vote_label, logits, counts))

    ref_label, ref_logits, ref_counts = _reference(x, adj, w1, b1, w2, b2, wc, bc)
    assert int(vote_label) == int(ref_label), (int(vote_label), int(ref_label))
    assert jnp.allclose(logits, ref_logits, atol=1e-4, rtol=1e-4)
    assert jnp.array_equal(counts, ref_counts)

    # TODO(synk): Hasher.generate_mixed_subgraphs and DataLoader shuffling have no
    # kernel equivalent; subgraph generation is emulated deterministically in glue.
    print("KERNEL_OK")
</pallas_src>

<mosaic_0001>
module attributes {stable_mosaic.version = 11 : i64} {
  func.func @robust_classifier_kernel(%arg0: i32, %arg1: memref<128x32xf32, #tpu.memory_space<vmem>>, %arg2: memref<128x128xf32, #tpu.memory_space<vmem>>, %arg3: memref<8x128xf32, #tpu.memory_space<vmem>>, %arg4: memref<32x64xf32, #tpu.memory_space<vmem>>, %arg5: memref<1x64xf32, #tpu.memory_space<vmem>>, %arg6: memref<64x64xf32, #tpu.memory_space<vmem>>, %arg7: memref<1x64xf32, #tpu.memory_space<vmem>>, %arg8: memref<64x8xf32, #tpu.memory_space<vmem>>, %arg9: memref<1x8xf32, #tpu.memory_space<vmem>>, %arg10: memref<8x8xf32, #tpu.memory_space<vmem>>) attributes {dimension_semantics = [#tpu.dimension_semantics<arbitrary>], iteration_bounds = array<i64: 1>, scalar_prefetch = 0 : i64, scratch_operands = 0 : i64, tpu.core_type = #tpu.core_type<tc>, window_params = [{pipeline_mode = #tpu.pipeline_mode<synchronous>, transform_indices = @transform_0, window_bounds = array<i64: 128, 32>}, {pipeline_mode = #tpu.pipeline_mode<synchronous>, transform_indices = @transform_1, window_bounds = array<i64: 128, 128>}, {pipeline_mode = #tpu.pipeline_mode<synchronous>, transform_indices = @transform_2, window_bounds = array<i64: 8, 128>}, {pipeline_mode = #tpu.pipeline_mode<synchronous>, transform_indices = @transform_3, window_bounds = array<i64: 32, 64>}, {pipeline_mode = #tpu.pipeline_mode<synchronous>, transform_indices = @transform_4, window_bounds = array<i64: 1, 64>}, {pipeline_mode = #tpu.pipeline_mode<synchronous>, transform_indices = @transform_5, window_bounds = array<i64: 64, 64>}, {pipeline_mode = #tpu.pipeline_mode<synchronous>, transform_indices = @transform_6, window_bounds = array<i64: 1, 64>}, {pipeline_mode = #tpu.pipeline_mode<synchronous>, transform_indices = @transform_7, window_bounds = array<i64: 64, 8>}, {pipeline_mode = #tpu.pipeline_mode<synchronous>, transform_indices = @transform_8, window_bounds = array<i64: 1, 8>}, {pipeline_mode = #tpu.pipeline_mode<synchronous>, transform_indices = @transform_9, window_bounds = array<i64: 8, 8>}]} {
    %c0 = arith.constant 0 : index
    %c0_0 = arith.constant 0 : index
    %0 = vector.load %arg1[%c0, %c0_0] : memref<128x32xf32, #tpu.memory_space<vmem>>, vector<128x32xf32>
    %c0_1 = arith.constant 0 : index
    %c0_2 = arith.constant 0 : index
    %1 = vector.load %arg2[%c0_1, %c0_2] : memref<128x128xf32, #tpu.memory_space<vmem>>, vector<128x128xf32>
    %cst = arith.constant dense<0.000000e+00> : vector<128x32xf32>
    %2 = tpu.matmul %1, %0, %cst {dimension_numbers = #tpu.dot_dimension_numbers<[1], [0], [0], [1], [0, 0, 1, 1], [], []>} : vector<128x128xf32>, vector<128x32xf32>, vector<128x32xf32> -> vector<128x32xf32>
    %c0_3 = arith.constant 0 : index
    %c0_4 = arith.constant 0 : index
    %3 = vector.load %arg4[%c0_3, %c0_4] : memref<32x64xf32, #tpu.memory_space<vmem>>, vector<32x64xf32>
    %cst_5 = arith.constant dense<0.000000e+00> : vector<128x64xf32>
    %4 = tpu.matmul %2, %3, %cst_5 {dimension_numbers = #tpu.dot_dimension_numbers<[1], [0], [0], [1], [0, 0, 1, 1], [], []>} : vector<128x32xf32>, vector<32x64xf32>, vector<128x64xf32> -> vector<128x64xf32>
    %c0_6 = arith.constant 0 : index
    %c0_7 = arith.constant 0 : index
    %5 = vector.load %arg5[%c0_6, %c0_7] : memref<1x64xf32, #tpu.memory_space<vmem>>, vector<1x64xf32>
    %6 = vector.broadcast %5 : vector<1x64xf32> to vector<128x64xf32>
    %7 = arith.addf %4, %6 : vector<128x64xf32>
    %cst_8 = arith.constant 0.000000e+00 : f32
    %8 = vector.broadcast %cst_8 : f32 to vector<128x64xf32>
    %9 = arith.maximumf %7, %8 : vector<128x64xf32>
    %c0_9 = arith.constant 0 : index
    %c0_10 = arith.constant 0 : index
    %10 = vector.load %arg6[%c0_9, %c0_10] : memref<64x64xf32, #tpu.memory_space<vmem>>, vector<64x64xf32>
    %cst_11 = arith.constant dense<0.000000e+00> : vector<128x64xf32>
    %11 = tpu.matmul %9, %10, %cst_11 {dimension_numbers = #tpu.dot_dimension_numbers<[1], [0], [0], [1], [0, 0, 1, 1], [], []>} : vector<128x64xf32>, vector<64x64xf32>, vector<128x64xf32> -> vector<128x64xf32>
    %c0_12 = arith.constant 0 : index
    %c0_13 = arith.constant 0 : index
    %12 = vector.load %arg7[%c0_12, %c0_13] : memref<1x64xf32, #tpu.memory_space<vmem>>, vector<1x64xf32>
    %13 = vector.broadcast %12 : vector<1x64xf32> to vector<128x64xf32>
    %14 = arith.addf %11, %13 : vector<128x64xf32>
    %cst_14 = arith.constant 0.000000e+00 : f32
    %15 = vector.broadcast %cst_14 : f32 to vector<128x64xf32>
    %16 = arith.maximumf %14, %15 : vector<128x64xf32>
    %c0_15 = arith.constant 0 : index
    %c0_16 = arith.constant 0 : index
    %17 = vector.load %arg3[%c0_15, %c0_16] : memref<8x128xf32, #tpu.memory_space<vmem>>, vector<8x128xf32>
    %cst_17 = arith.constant dense<0.000000e+00> : vector<8x64xf32>
    %18 = tpu.matmul %17, %16, %cst_17 {dimension_numbers = #tpu.dot_dimension_numbers<[1], [0], [0], [1], [0, 0, 1, 1], [], []>} : vector<8x128xf32>, vector<128x64xf32>, vector<8x64xf32> -> vector<8x64xf32>
    %c0_18 = arith.constant 0 : index
    %c0_19 = arith.constant 0 : index
    %19 = vector.load %arg8[%c0_18, %c0_19] : memref<64x8xf32, #tpu.memory_space<vmem>>, vector<64x8xf32>
    %cst_20 = arith.constant dense<0.000000e+00> : vector<8x8xf32>
    %20 = tpu.matmul %18, %19, %cst_20 {dimension_numbers = #tpu.dot_dimension_numbers<[1], [0], [0], [1], [0, 0, 1, 1], [], []>} : vector<8x64xf32>, vector<64x8xf32>, vector<8x8xf32> -> vector<8x8xf32>
    %c0_21 = arith.constant 0 : index
    %c0_22 = arith.constant 0 : index
    %21 = vector.load %arg9[%c0_21, %c0_22] : memref<1x8xf32, #tpu.memory_space<vmem>>, vector<1x8xf32>
    %22 = vector.broadcast %21 : vector<1x8xf32> to vector<8x8xf32>
    %23 = arith.addf %20, %22 : vector<8x8xf32>
    %c0_23 = arith.constant 0 : index
    %c0_24 = arith.constant 0 : index
    %24 = vector.load %arg10[%c0_23, %c0_24] : memref<8x8xf32, #tpu.memory_space<vmem>>, vector<8x8xf32>
    tpu.vector_store %arg10[%c0_23, %c0_24], %23 {strides = array<i32>} : memref<8x8xf32, #tpu.memory_space<vmem>>, vector<8x8xf32>,
    return
  }
  func.func @transform_0(%arg0: i32) -> (i32, i32) {
    %c0_i32 = arith.constant 0 : i32
    %c0_i32_0 = arith.constant 0 : i32
    %c0_i32_1 = arith.constant 0 : i32
    return %c0_i32, %c0_i32_0 : i32, i32
  }
  func.func @transform_1(%arg0: i32) -> (i32, i32) {
    %c0_i32 = arith.constant 0 : i32
    %c0_i32_0 = arith.constant 0 : i32
    %c0_i32_1 = arith.constant 0 : i32
    return %c0_i32, %c0_i32_0 : i32, i32
  }
  func.func @transform_2(%arg0: i32) -> (i32, i32) {
    %c0_i32 = arith.constant 0 : i32
    %c0_i32_0 = arith.constant 0 : i32
    %c0_i32_1 = arith.constant 0 : i32
    return %c0_i32, %c0_i32_0 : i32, i32
  }
  func.func @transform_3(%arg0: i32) -> (i32, i32) {
    %c0_i32 = arith.constant 0 : i32
    %c0_i32_0 = arith.constant 0 : i32
    %c0_i32_1 = arith.constant 0 : i32
    return %c0_i32, %c0_i32_0 : i32, i32
  }
  func.func @transform_4(%arg0: i32) -> (i32, i32) {
    %c0_i32 = arith.constant 0 : i32
    %c0_i32_0 = arith.constant 0 : i32
    %c0_i32_1 = arith.constant 0 : i32
    return %c0_i32, %c0_i32_0 : i32, i32
  }
  func.func @transform_5(%arg0: i32) -> (i32, i32) {
    %c0_i32 = arith.constant 0 : i32
    %c0_i32_0 = arith.constant 0 : i32
    %c0_i32_1 = arith.constant 0 : i32
    return %c0_i32, %c0_i32_0 : i32, i32
  }
  func.func @transform_6(%arg0: i32) -> (i32, i32) {
    %c0_i32 = arith.constant 0 : i32
    %c0_i32_0 = arith.constant 0 : i32
    %c0_i32_1 = arith.constant 0 : i32
    return %c0_i32, %c0_i32_0 : i32, i32
  }
  func.func @transform_7(%arg0: i32) -> (i32, i32) {
    %c0_i32 = arith.constant 0 : i32
    %c0_i32_0 = arith.constant 0 : i32
    %c0_i32_1 = arith.constant 0 : i32
    return %c0_i32, %c0_i32_0 : i32, i32
  }
  func.func @transform_8(%arg0: i32) -> (i32, i32) {
    %c0_i32 = arith.constant 0 : i32
    %c0_i32_0 = arith.constant 0 : i32
    %c0_i32_1 = arith.constant 0 : i32
    return %c0_i32, %c0_i32_0 : i32, i32
  }
  func.func @transform_9(%arg0: i32) -> (i32, i32) {
    %c0_i32 = arith.constant 0 : i32
    %c0_i32_0 = arith.constant 0 : i32
    %c0_i32_1 = arith.constant 0 : i32
    return %c0_i32, %c0_i32_0 : i32, i32
  }
}

</mosaic_0001>

<bundles_post_ra>
// kernel: tpu_custom_call.1
= control target key start
LH: loop header
LB: loop body
LE: loop exit
PB: predicated region body
PF: predicated region fallthrough
CT: control target
= control target key end

     0   :  { %s1568_s0 = inlined_call_operand.vmem [shape: f32[128,32], index: 0, kind: input, shape index: {}]   ;;  %s1569_s1 = inlined_call_operand.vmem [shape: f32[128,128], index: 1, kind: input, shape index: {}]   ;;  %s1570_s2 = inlined_call_operand.vmem [shape: f32[8,128], index: 2, kind: input, shape index: {}]   ;;  %s1571_s3 = inlined_call_operand.vmem [shape: f32[32,64], index: 3, kind: input, shape index: {}]   ;;  %s1572_s4 = inlined_call_operand.vmem [shape: f32[1,64], index: 4, kind: input, shape index: {}]   ;;  %s1573_s5 = inlined_call_operand.vmem [shape: f32[64,64], index: 5, kind: input, shape index: {}]   ;;  %s1574_s6 = inlined_call_operand.vmem [shape: f32[1,64], index: 6, kind: input, shape index: {}]   ;;  %s1575_s7 = inlined_call_operand.vmem [shape: f32[64,8], index: 7, kind: input, shape index: {}]   ;;  %s1576_s8 = inlined_call_operand.vmem [shape: f32[1,8], index: 8, kind: input, shape index: {}]   ;;  %s1577_s9 = inlined_call_operand.hbm [shape: f32[8,8], index: 9, kind: output, shape index: {}]  }
   0x1   :  { %v33_v0 = vld [vmem:[%s1568_s0] sm:$0xff]  ;;  %v34_v1 = vld [vmem:[%s1568_s0 + $0x8] sm:$0xff]  ;;  %v35_v2 = vld [vmem:[%s1568_s0 + $0x10] sm:$0xff] }
   0x2   :  { %v1151_v3 = vpack.c.bf16 %v34_v1, %v33_v0  ;;  %v36_v4 = vld [vmem:[%s1568_s0 + $0x18] sm:$0xff]  ;;  %v37_v6 = vld [vmem:[%s1568_s0 + $0x20] sm:$0xff]  ;;  %v38_v7 = vld [vmem:[%s1568_s0 + $0x28] sm:$0xff] }
   0x3   :  { %v1155_v5 = vpack.c.bf16 %v36_v4, %v35_v2  ;;  %v1159_v8 = vpack.c.bf16 %v38_v7, %v37_v6  ;;  %v49_v9 = vld [vmem:[%s1569_s1] sm:$0xff]  ;;  %v39_v10 = vld [vmem:[%s1568_s0 + $0x30] sm:$0xff]  ;;  %v40_v11 = vld [vmem:[%s1568_s0 + $0x38] sm:$0xff] }
   0x4   :  { %1152 = vmatprep.subr.bf16.mxu0 %v1151_v3  ;;  %1001 = vmatprep.mubr.f32.mxu0 %v49_v9  ;;  %v1163_v12 = vpack.c.bf16 %v40_v11, %v39_v10  ;;  %v41_v13 = vld [vmem:[%s1568_s0 + $0x40] sm:$0xff]  ;;  %v42_v14 = vld [vmem:[%s1568_s0 + $0x48] sm:$0xff]  ;;  %v212_v17 = vld [vmem:[%s1571_s3 + $0x10] sm:$0xff] }
   0x5   :  { %1154 = vmatpush3.bf16.msra.mxu0 %v1151_v3  ;;  %v210_v15 = vld [vmem:[%s1571_s3] sm:$0xff]  ;;  %v211_v16 = vld [vmem:[%s1571_s3 + $0x8] sm:$0xff]  ;;  %v213_v18 = vld [vmem:[%s1571_s3 + $0x18] sm:$0xff] }
   0x6   :  { %1156 = vmatprep.subr.bf16.mxu0 %v1155_v5  ;;  %v1183_v19 = vpack.c.bf16 %v211_v16, %v210_v15  ;;  %v1187_v20 = vpack.c.bf16 %v213_v18, %v212_v17 }
   0x9   :  { %1158 = vmatpush3.bf16.msra.mxu0 %v1155_v5 }
   0xa   :  { %1160 = vmatprep.subr.bf16.mxu0 %v1159_v8 }
   0xd   :  { %1162 = vmatpush3.bf16.msra.mxu0 %v1159_v8 }
   0xe   :  { %14 = vsyncpa [#allocation3], 0  ;;  %1164 = vmatprep.subr.bf16.mxu0 %v1163_v12  ;;  %v1167_v21 = vpack.c.bf16 %v42_v14, %v41_v13  ;;  %v43_v22 = vld [vmem:[%s1568_s0 + $0x50] sm:$0xff]  ;;  %v44_v23 = vld [vmem:[%s1568_s0 + $0x58] sm:$0xff]  ;;  %1184 = vmatprep.subr.bf16.mxu1 %v1183_v19  ;;  %vm221_vm0 = vcmask 261120   ;;  %vm446_vm1 = vcmask 523264  }
   0xf   :  { %1186 = vmatpush3.bf16.msra.mxu1 %v1183_v19  ;;  %v1171_v24 = vpack.c.bf16 %v44_v23, %v43_v22  ;;  %v45_v25 = vld [vmem:[%s1568_s0 + $0x60] sm:$0xff]  ;;  %v46_v26 = vld [vmem:[%s1568_s0 + $0x68] sm:$0xff]  ;;  %v47_v28 = vld [vmem:[%s1568_s0 + $0x70] sm:$0xff]  ;;  %vm1272_vm2 = vmmov 0   ;;  %s1274_s24 = smov [#allocation2]   ;;  %vm815_vm3 = vcmask 64512  }
  0x10   :  { %1188 = vmatprep.subr.bf16.mxu1 %v1187_v20  ;;  %v1175_v27 = vpack.c.bf16 %v46_v26, %v45_v25  ;;  %v48_v29 = vld [vmem:[%s1568_s0 + $0x78] sm:$0xff]  ;;  %v50_v31 = vld [vmem:[%s1569_s1 + $0x8] sm:$0xff]  ;;  %v51_v32 = vld [vmem:[%s1569_s1 + $0x10] sm:$0xff]  ;;  %s823_s25 = sshll.u32 %s1274_s24, 4  ;;  %s824_s25 = int_to_ptr.vmem [resolvable:$true] %s823_s25 }
  0x11   :  { %1166 = vmatpush3.bf16.msra.mxu0 %v1163_v12  ;;  %v1179_v30 = vpack.c.bf16 %v48_v29, %v47_v28  ;;  %v52_v33 = vld [vmem:[%s1569_s1 + $0x18] sm:$0xff]  ;;  %v53_v34 = vld [vmem:[%s1569_s1 + $0x20] sm:$0xff]  ;;  %v54_v35 = vld [vmem:[%s1569_s1 + $0x28] sm:$0xff]  ;;  %s1247_s26 = scalar_lea.vmem %s824_s25, 128  ;;  %p1252_p1 = scmp.lt.s32.totalorder %s824_s25, %s824_s25 }
  0x12   :  { %1168 = vmatprep.subr.bf16.mxu0 %v1167_v21  ;;  %v55_v36 = vld [vmem:[%s1569_s1 + $0x30] sm:$0xff]  ;;  %v56_v37 = vld [vmem:[%s1569_s1 + $0x38] sm:$0xff]  ;;  %v57_v38 = vld [vmem:[%s1569_s1 + $0x40] sm:$0xff]  ;;  %p1248_p0 = scmp.ne.s32.totalorder %s824_s25, %s1247_s26  ;;  %p1253_p2 = scmp.lt.s32.totalorder %s1247_s26, %s1247_s26 }
  0x13   :  { %1190 = vmatpush3.bf16.msra.mxu1 %v1187_v20  ;;  %v58_v39 = vld [vmem:[%s1569_s1 + $0x48] sm:$0xff]  ;;  %v59_v40 = vld [vmem:[%s1569_s1 + $0x50] sm:$0xff]  ;;  %v60_v41 = vld [vmem:[%s1569_s1 + $0x58] sm:$0xff] }
  0x14   :  { %v61_v42 = vld [vmem:[%s1569_s1 + $0x60] sm:$0xff]  ;;  %v62_v43 = vld [vmem:[%s1569_s1 + $0x68] sm:$0xff]  ;;  %v63_v44 = vld [vmem:[%s1569_s1 + $0x70] sm:$0xff]  ;;  %p1254_p3 = por %p1253_p2, %p1252_p1 }
  0x15   :  { %1170 = vmatpush3.bf16.msra.mxu0 %v1167_v21  ;;  %v64_v45 = vld [vmem:[%s1569_s1 + $0x78] sm:$0xff]  ;;  %v431_v46 = vld [vmem:[%s1573_s5] sm:$0xff]  ;;  %v432_v47 = vld [vmem:[%s1573_s5 + $0x8] sm:$0xff] }
  0x16   :  { %1172 = vmatprep.subr.bf16.mxu0 %v1171_v24  ;;  %v1191_v48 = vpack.c.bf16 %v432_v47, %v431_v46  ;;  %v433_v49 = vld [vmem:[%s1573_s5 + $0x10] sm:$0xff]  ;;  %v434_v50 = vld [vmem:[%s1573_s5 + $0x18] sm:$0xff]  ;;  %v435_v54 = vld [vmem:[%s1573_s5 + $0x20] sm:$0xff]  ;;  %p1255_p4 = pnand %p1254_p3, %p1248_p0 }
  0x17   :  { %v1195_v53 = vpack.c.bf16 %v434_v50, %v433_v49  ;;  %v436_v55 = vld [vmem:[%s1573_s5 + $0x28] sm:$0xff]  ;;  %v437_v59 = vld [vmem:[%s1573_s5 + $0x30] sm:$0xff]  ;;  %v438_v60 = vld [vmem:[%s1573_s5 + $0x38] sm:$0xff] }
  0x18   :  { %1192 = vmatprep.subr.bf16.mxu1 %v1191_v48  ;;  %v1199_v58 = vpack.c.bf16 %v436_v55, %v435_v54  ;;  %v1203_v63 = vpack.c.bf16 %v438_v60, %v437_v59  ;;  %v831_v10 = vld [vmem:[%s1572_s4] ss:$0 sm:$0xff]  ;;  %v1271_v59 = vmov 0.0|0.0   ;;  %v1273_v60 = vmov 0.0  }
  0x19   :  { %1174 = vmatpush3.bf16.msra.mxu0 %v1171_v24 }
  0x1a   :  { %1176 = vmatprep.subr.bf16.mxu0 %v1175_v27 }
  0x1d   :  { %1178 = vmatpush3.bf16.msra.mxu0 %v1175_v27 }
  0x1e   :  { %1180 = vmatprep.subr.bf16.mxu0 %v1179_v30 }
  0x21   :  { %1182 = vmatpush3.bf16.msra.mxu0 %v1179_v30 }
  0x22   :  { %1207 = vmatprep.subr.bf16.mxu0 %v1271_v59 }
  0x24   :  { %1002 = vmatmul.mubr.f32.vlgmr.msra.gmra.mrb[0].mxu0 %v50_v31 }
  0x25   :  { %1004 = vmatprep.mubr.f32.mxu0 %v51_v32 }
  0x28   :  { %1005 = vmatmul.mubr.f32.gmra.mrb[2].mxu0 %v52_v33 }
  0x29   :  { %1007 = vmatprep.mubr.f32.mxu0 %v53_v34 }
  0x2c   :  { %1008 = vmatmul.mubr.f32.gmra.mrb[4].mxu0 %v54_v35 }
  0x2d   :  { %1010 = vmatprep.mubr.f32.mxu0 %v55_v36 }
  0x30   :  { %1011 = vmatmul.mubr.f32.gmra.mrb[6].mxu0 %v56_v37 }
  0x31   :  { %1013 = vmatprep.mubr.f32.mxu0 %v57_v38 }
  0x34   :  { %1014 = vmatmul.mubr.f32.gmra.mrb[8].mxu0 %v58_v39 }
  0x35   :  { %1016 = vmatprep.mubr.f32.mxu0 %v59_v40 }
  0x38   :  { %1017 = vmatmul.mubr.f32.gmra.mrb[10].mxu0 %v60_v41 }
  0x39   :  { %1019 = vmatprep.mubr.f32.mxu0 %v61_v42 }
  0x3c   :  { %1020 = vmatmul.mubr.f32.gmra.mrb[12].mxu0 %v62_v43 }
  0x3d   :  { %1022 = vmatprep.mubr.f32.mxu0 %v63_v44 }
  0x40   :  { %1023 = vmatmul.mubr.f32.gmra.mrb[14].mxu0 %v64_v45 }
  0x41   :  { %1129 = vmatprep.mubr.msk.f32.mxu0 %vm1272_vm2, %v1273_v60 }
  0xf7   :  { %v1003_v51 = vpop.f32.mrb[0].mxu0 }
  0xf8   :  { %v131_v52 = vpop.f32.mrb[1].mxu0 }
  0xf9   :  { %1033 = vmatprep.mubr.msk.f32.mxu1 %vm221_vm0, %v131_v52 }
  0xfa   :  { %1034 = vmatmul.mubr.msk.f32.vlgmr.msra.gmra.mrb[0].mxu1 %vm221_vm0, %v1003_v51 }
  0xfb   :  { %v1006_v56 = vpop.f32.mrb[2].mxu0  ;;  %1194 = vmatpush3.bf16.msra.mxu1 %v1191_v48 }
  0xfc   :  { %v141_v57 = vpop.f32.mrb[3].mxu0  ;;  %1196 = vmatprep.subr.bf16.mxu1 %v1195_v53 }
  0xfd   :  { %1036 = vmatprep.mubr.msk.f32.mxu1 %vm221_vm0, %v141_v57 }
  0xfe   :  { %1037 = vmatmul.mubr.msk.f32.gmra.mrb[2].mxu1 %vm221_vm0, %v1006_v56 }
  0xff   :  { %v1009_v61 = vpop.f32.mrb[4].mxu0  ;;  %1198 = vmatpush3.bf16.msra.mxu1 %v1195_v53 }
 0x100   :  { %v151_v62 = vpop.f32.mrb[5].mxu0  ;;  %1200 = vmatprep.subr.bf16.mxu1 %v1199_v58 }
 0x101   :  { %1039 = vmatprep.mubr.msk.f32.mxu1 %vm221_vm0, %v151_v62  ;;  %v728_v62 = vld [vmem:[%s1575_s7 + $0x8] sm:$0xff] }
 0x102   :  { %1040 = vmatmul.mubr.msk.f32.gmra.mrb[4].mxu1 %vm221_vm0, %v1009_v61  ;;  %v727_v61 = vld [vmem:[%s1575_s7] sm:$0xff] }
 0x103   :  { %v1012_v0 = vpop.f32.mrb[6].mxu0  ;;  %1202 = vmatpush3.bf16.msra.mxu1 %v1199_v58 }
 0x104   :  { %v161_v1 = vpop.f32.mrb[7].mxu0  ;;  %1204 = vmatprep.subr.bf16.mxu1 %v1203_v63 }
 0x105   :  { %1042 = vmatprep.mubr.msk.f32.mxu1 %vm221_vm0, %v161_v1  ;;  %v730_v1 = vld [vmem:[%s1575_s7 + $0x18] sm:$0xff] }
 0x106   :  { %1043 = vmatmul.mubr.msk.f32.gmra.mrb[6].mxu1 %vm221_vm0, %v1012_v0  ;;  %v1232_v0 = vpack.c.bf16 %v728_v62, %v727_v61 }
 0x107   :  { %v1015_v2 = vpop.f32.mrb[8].mxu0  ;;  %1206 = vmatpush3.bf16.msra.mxu1 %v1203_v63  ;;  %v729_v63 = vld [vmem:[%s1575_s7 + $0x10] sm:$0xff] }
 0x108   :  { %v171_v3 = vpop.f32.mrb[9].mxu0  ;;  %1231 = vmatprep.subr.bf16.mxu1 %v1271_v59 }
 0x109   :  { %1045 = vmatprep.mubr.msk.f32.mxu1 %vm221_vm0, %v171_v3  ;;  %v731_v3 = vld [vmem:[%s1575_s7 + $0x20] sm:$0xff] }
 0x10a   :  { %1046 = vmatmul.mubr.msk.f32.gmra.mrb[8].mxu1 %vm221_vm0, %v1015_v2  ;;  %v1235_v2 = vpack.c.bf16 %v730_v1, %v729_v63 }
 0x10b   :  { %v1018_v4 = vpop.f32.mrb[10].mxu0 }
 0x10c   :  { %v181_v5 = vpop.f32.mrb[11].mxu0 }
 0x10d   :  { %1048 = vmatprep.mubr.msk.f32.mxu1 %vm221_vm0, %v181_v5 }
 0x10e   :  { %1049 = vmatmul.mubr.msk.f32.gmra.mrb[10].mxu1 %vm221_vm0, %v1018_v4  ;;  %v732_v4 = vld [vmem:[%s1575_s7 + $0x28] sm:$0xff] }
 0x10f   :  { %v1021_v6 = vpop.f32.mrb[12].mxu0  ;;  %v1238_v5 = vpack.c.bf16 %v732_v4, %v731_v3  ;;  %v656_v3 = vld [vmem:[%s1570_s2] sm:$0xff] }
 0x110   :  { %v191_v7 = vpop.f32.mrb[13].mxu0 }
 0x111   :  { %1051 = vmatprep.mubr.msk.f32.mxu1 %vm221_vm0, %v191_v7  ;;  %v734_v7 = vld [vmem:[%s1575_s7 + $0x38] sm:$0xff] }
 0x112   :  { %1052 = vmatmul.mubr.msk.f32.gmra.mrb[12].mxu1 %vm221_vm0, %v1021_v6  ;;  %v733_v6 = vld [vmem:[%s1575_s7 + $0x30] sm:$0xff] }
 0x113   :  { %v1024_v8 = vpop.f32.mrb[14].mxu0 }
 0x114   :  { %v201_v9 = vpop.f32.mrb[15].mxu0 }
 0x115   :  { %1054 = vmatprep.mubr.msk.f32.mxu1 %vm221_vm0, %v201_v9  ;;  %v1524_v9 = vld [vmem:[%s1574_s6] ss:$0 sm:$0xff] }
 0x116   :  { %1055 = vmatmul.mubr.msk.f32.gmra.mrb[14].mxu1 %vm221_vm0, %v1024_v8  ;;  %v1241_v8 = vpack.c.bf16 %v734_v7, %v733_v6  ;;  %v865_v6 = vld [vmem:[%s1576_s8] ss:$0 sm:$0xff] }
 0x1cd   :  { %v1035_v11 = vpop.f32.mrb[0].mxu1 }
 0x1ce   :  { %v342_v12 = vadd.f32 %v1035_v11, %v831_v10  ;;  %v336_v13 = vpop.f32.mrb[1].mxu1 }
 0x1cf   :  { %v337_v14 = vadd.f32 %v831_v10, %v336_v13 }
 0x1d0   :  { %v416_v17 = vmax.f32 %v342_v12, 0.0 }
 0x1d1   :  { %v415_v15 = vmax.f32 %v337_v14, 0.0  ;;  %v1038_v16 = vpop.f32.mrb[2].mxu1 }
 0x1d2   :  { %v352_v18 = vadd.f32 %v1038_v16, %v831_v10  ;;  %v346_v19 = vpop.f32.mrb[3].mxu1 }
 0x1d3   :  { %v347_v20 = vadd.f32 %v831_v10, %v346_v19  ;;  %1073 = vmatprep.mubr.msk.f32.mxu1 %vm446_vm1, %v415_v15 }
 0x1d4   :  { %1074 = vmatmul.mubr.msk.f32.vlgmr.msra.gmra.mrb[16].mxu1 %vm446_vm1, %v416_v17  ;;  %v418_v23 = vmax.f32 %v352_v18, 0.0 }
 0x1d5   :  { %v417_v21 = vmax.f32 %v347_v20, 0.0  ;;  %v1041_v22 = vpop.f32.mrb[4].mxu1  ;;  %1233 = vmatpush3.bf16.msra.mxu1 %v1232_v0 }
 0x1d6   :  { %v362_v24 = vadd.f32 %v1041_v22, %v831_v10  ;;  %v356_v25 = vpop.f32.mrb[5].mxu1  ;;  %1234 = vmatprep.subr.bf16.mxu1 %v1271_v59 }
 0x1d7   :  { %v357_v26 = vadd.f32 %v831_v10, %v356_v25  ;;  %1076 = vmatprep.mubr.msk.f32.mxu1 %vm446_vm1, %v417_v21 }
 0x1d8   :  { %1077 = vmatmul.mubr.msk.f32.gmra.mrb[18].mxu1 %vm446_vm1, %v418_v23  ;;  %v420_v29 = vmax.f32 %v362_v24, 0.0 }
 0x1d9   :  { %v419_v27 = vmax.f32 %v357_v26, 0.0  ;;  %v1044_v28 = vpop.f32.mrb[6].mxu1  ;;  %1236 = vmatpush3.bf16.msra.mxu1 %v1235_v2 }
 0x1da   :  { %v372_v30 = vadd.f32 %v1044_v28, %v831_v10  ;;  %v366_v31 = vpop.f32.mrb[7].mxu1  ;;  %1237 = vmatprep.subr.bf16.mxu1 %v1271_v59 }
 0x1db   :  { %v367_v32 = vadd.f32 %v831_v10, %v366_v31  ;;  %1079 = vmatprep.mubr.msk.f32.mxu1 %vm446_vm1, %v419_v27 }
 0x1dc   :  { %1080 = vmatmul.mubr.msk.f32.gmra.mrb[20].mxu1 %vm446_vm1, %v420_v29  ;;  %v422_v35 = vmax.f32 %v372_v30, 0.0 }
 0x1dd   :  { %v421_v33 = vmax.f32 %v367_v32, 0.0  ;;  %v1047_v34 = vpop.f32.mrb[8].mxu1  ;;  %1239 = vmatpush3.bf16.msra.mxu1 %v1238_v5 }
 0x1de   :  { %v382_v36 = vadd.f32 %v1047_v34, %v831_v10  ;;  %v376_v37 = vpop.f32.mrb[9].mxu1  ;;  %1240 = vmatprep.subr.bf16.mxu1 %v1271_v59 }
 0x1df   :  { %v377_v38 = vadd.f32 %v831_v10, %v376_v37  ;;  %1082 = vmatprep.mubr.msk.f32.mxu1 %vm446_vm1, %v421_v33 }
 0x1e0   :  { %1083 = vmatmul.mubr.msk.f32.gmra.mrb[22].mxu1 %vm446_vm1, %v422_v35  ;;  %v424_v41 = vmax.f32 %v382_v36, 0.0 }
 0x1e1   :  { %v423_v39 = vmax.f32 %v377_v38, 0.0  ;;  %v1050_v40 = vpop.f32.mrb[10].mxu1  ;;  %1242 = vmatpush3.bf16.msra.mxu1 %v1241_v8 }
 0x1e2   :  { %v392_v42 = vadd.f32 %v1050_v40, %v831_v10  ;;  %v386_v43 = vpop.f32.mrb[11].mxu1 }
 0x1e3   :  { %v387_v44 = vadd.f32 %v831_v10, %v386_v43  ;;  %1085 = vmatprep.mubr.msk.f32.mxu1 %vm446_vm1, %v423_v39 }
 0x1e4   :  { %1086 = vmatmul.mubr.msk.f32.gmra.mrb[24].mxu1 %vm446_vm1, %v424_v41  ;;  %v426_v47 = vmax.f32 %v392_v42, 0.0 }
 0x1e5   :  { %v425_v45 = vmax.f32 %v387_v44, 0.0  ;;  %v1053_v46 = vpop.f32.mrb[12].mxu1 }
 0x1e6   :  { %v402_v48 = vadd.f32 %v1053_v46, %v831_v10  ;;  %v396_v49 = vpop.f32.mrb[13].mxu1 }
 0x1e7   :  { %v397_v50 = vadd.f32 %v831_v10, %v396_v49  ;;  %1088 = vmatprep.mubr.msk.f32.mxu1 %vm446_vm1, %v425_v45 }
 0x1e8   :  { %1089 = vmatmul.mubr.msk.f32.gmra.mrb[26].mxu1 %vm446_vm1, %v426_v47  ;;  %v428_v53 = vmax.f32 %v402_v48, 0.0 }
 0x1e9   :  { %v427_v51 = vmax.f32 %v397_v50, 0.0  ;;  %v1056_v52 = vpop.f32.mrb[14].mxu1 }
 0x1ea   :  { %v412_v54 = vadd.f32 %v1056_v52, %v831_v10  ;;  %v406_v55 = vpop.f32.mrb[15].mxu1 }
 0x1eb   :  { %v407_v56 = vadd.f32 %v831_v10, %v406_v55  ;;  %1091 = vmatprep.mubr.msk.f32.mxu1 %vm446_vm1, %v427_v51 }
 0x1ec   :  { %1092 = vmatmul.mubr.msk.f32.gmra.mrb[28].mxu1 %vm446_vm1, %v428_v53  ;;  %v430_v58 = vmax.f32 %v412_v54, 0.0 }
 0x1ed   :  { %v429_v57 = vmax.f32 %v407_v56, 0.0 }
 0x1ef   :  { %1094 = vmatprep.mubr.msk.f32.mxu1 %vm446_vm1, %v429_v57 }
 0x1f0   :  { %1095 = vmatmul.mubr.msk.f32.gmra.mrb[30].mxu1 %vm446_vm1, %v430_v58 }
 0x1f1   :  { %1148 = vmatprep.mubr.msk.f32.mxu1 %vm1272_vm2, %v1273_v60 }
 0x2a7   :  { %v1075_v10 = vpop.f32.mrb[16].mxu1 }
 0x2a8   :  { %v567_v11 = vadd.f32 %v1075_v10, %v1524_v9  ;;  %v561_v12 = vpop.f32.mrb[17].mxu1 }
 0x2a9   :  { %v562_v13 = vadd.f32 %v1524_v9, %v561_v12 }
 0x2aa   :  { %v641_v14 = vmax.f32 %v567_v11, 0.0 }
 0x2ab   :  { %v640_v15 = vmax.f32 %v562_v13, 0.0  ;;  %v1078_v16 = vpop.f32.mrb[18].mxu1 }
 0x2ac   :  { %v577_v17 = vadd.f32 %v1078_v16, %v1524_v9  ;;  %v571_v18 = vpop.f32.mrb[19].mxu1 }
 0x2ad   :  { %v1208_v19 = vpack.c.bf16 %v641_v14, %v640_v15  ;;  %v572_v20 = vadd.f32 %v1524_v9, %v571_v18 }
 0x2ae   :  { %v643_v21 = vmax.f32 %v577_v17, 0.0 }
 0x2af   :  { %v642_v22 = vmax.f32 %v572_v20, 0.0  ;;  %v1081_v23 = vpop.f32.mrb[20].mxu1  ;;  %1209 = vmatpush3.bf16.msra.mxu0 %v1208_v19 }
 0x2b0   :  { %v587_v24 = vadd.f32 %v1081_v23, %v1524_v9  ;;  %v581_v25 = vpop.f32.mrb[21].mxu1  ;;  %1210 = vmatprep.subr.bf16.mxu0 %v1271_v59 }
 0x2b1   :  { %v1211_v26 = vpack.c.bf16 %v643_v21, %v642_v22  ;;  %v582_v27 = vadd.f32 %v1524_v9, %v581_v25 }
 0x2b2   :  { %v645_v28 = vmax.f32 %v587_v24, 0.0 }
 0x2b3   :  { %v644_v29 = vmax.f32 %v582_v27, 0.0  ;;  %v1084_v30 = vpop.f32.mrb[22].mxu1  ;;  %1212 = vmatpush3.bf16.msra.mxu0 %v1211_v26 }
 0x2b4   :  { %v597_v31 = vadd.f32 %v1084_v30, %v1524_v9  ;;  %v591_v32 = vpop.f32.mrb[23].mxu1  ;;  %1213 = vmatprep.subr.bf16.mxu0 %v1271_v59 }
 0x2b5   :  { %v1214_v33 = vpack.c.bf16 %v645_v28, %v644_v29  ;;  %v592_v34 = vadd.f32 %v1524_v9, %v591_v32 }
 0x2b6   :  { %v647_v35 = vmax.f32 %v597_v31, 0.0 }
 0x2b7   :  { %v646_v36 = vmax.f32 %v592_v34, 0.0  ;;  %v1087_v37 = vpop.f32.mrb[24].mxu1  ;;  %1215 = vmatpush3.bf16.msra.mxu0 %v1214_v33 }
 0x2b8   :  { %v607_v38 = vadd.f32 %v1087_v37, %v1524_v9  ;;  %v601_v39 = vpop.f32.mrb[25].mxu1  ;;  %1216 = vmatprep.subr.bf16.mxu0 %v1271_v59 }
 0x2b9   :  { %v1217_v40 = vpack.c.bf16 %v647_v35, %v646_v36  ;;  %v602_v41 = vadd.f32 %v1524_v9, %v601_v39 }
 0x2ba   :  { %v649_v42 = vmax.f32 %v607_v38, 0.0 }
 0x2bb   :  { %v648_v43 = vmax.f32 %v602_v41, 0.0  ;;  %v1090_v44 = vpop.f32.mrb[26].mxu1  ;;  %1218 = vmatpush3.bf16.msra.mxu0 %v1217_v40 }
 0x2bc   :  { %v617_v45 = vadd.f32 %v1090_v44, %v1524_v9  ;;  %v611_v46 = vpop.f32.mrb[27].mxu1  ;;  %1219 = vmatprep.subr.bf16.mxu0 %v1271_v59 }
 0x2bd   :  { %v1220_v47 = vpack.c.bf16 %v649_v42, %v648_v43  ;;  %v612_v48 = vadd.f32 %v1524_v9, %v611_v46 }
 0x2be   :  { %v651_v49 = vmax.f32 %v617_v45, 0.0 }
 0x2bf   :  { %v650_v50 = vmax.f32 %v612_v48, 0.0  ;;  %v1093_v51 = vpop.f32.mrb[28].mxu1  ;;  %1221 = vmatpush3.bf16.msra.mxu0 %v1220_v47 }
 0x2c0   :  { %v627_v52 = vadd.f32 %v1093_v51, %v1524_v9  ;;  %v621_v53 = vpop.f32.mrb[29].mxu1  ;;  %1222 = vmatprep.subr.bf16.mxu0 %v1271_v59 }
 0x2c1   :  { %v1223_v54 = vpack.c.bf16 %v651_v49, %v650_v50  ;;  %v622_v55 = vadd.f32 %v1524_v9, %v621_v53 }
 0x2c2   :  { %v653_v56 = vmax.f32 %v627_v52, 0.0 }
 0x2c3   :  { %v652_v57 = vmax.f32 %v622_v55, 0.0  ;;  %v1096_v58 = vpop.f32.mrb[30].mxu1  ;;  %1224 = vmatpush3.bf16.msra.mxu0 %v1223_v54 }
 0x2c4   :  { %v637_v60 = vadd.f32 %v1096_v58, %v1524_v9  ;;  %v631_v61 = vpop.f32.mrb[31].mxu1  ;;  %1225 = vmatprep.subr.bf16.mxu0 %v1271_v59 }
 0x2c5   :  { %v1226_v62 = vpack.c.bf16 %v653_v56, %v652_v57  ;;  %v632_v63 = vadd.f32 %v1524_v9, %v631_v61 }
 0x2c6   :  { %v655_v0 = vmax.f32 %v637_v60, 0.0 }
 0x2c7   :  { %v654_v1 = vmax.f32 %v632_v63, 0.0  ;;  %1227 = vmatpush3.bf16.msra.mxu0 %v1226_v62 }
 0x2c8   :  { %1228 = vmatprep.subr.bf16.mxu0 %v1271_v59 }
 0x2c9   :  { %v1229_v2 = vpack.c.bf16 %v655_v0, %v654_v1 }
 0x2cb   :  { %1230 = vmatpush3.bf16.msra.mxu0 %v1229_v2 }
 0x2ce   :  { %1130 = vmatmul.mubr.f32.vlgmr.msra.gmra.mrb[16].mxu0 %v656_v3 }
 0x3a1   :  { %v723_v4 = vpop.f32.mrb[16].mxu0 }
 0x3a2   :  { %v1131_v5 = vpop.f32.mrb[17].mxu0  ;;  %1149 = vmatmul.mubr.msk.f32.vlgmr.msra.gmra.mrb[32].mxu1 %vm446_vm1, %v723_v4 }
 0x475   :  { %v811_v7 = vpop.f32.mrb[32].mxu1 }
 0x476   :  { %v812_v59 = vadd.f32 %v865_v6, %v811_v7  ;;  %v1150_v8 = vpop.f32.mrb[33].mxu1 }
 0x478   :  { %816 = vst.msk [vmem:[#allocation2] sm:$0xff] %vm815_vm3, %v812_v59 }
 0x479   :  { %1258 = shalt.err (!%p1255_p4)
}
 0x47a   :  { %s1259_s5 = scalar_lea.hbm %s1577_s9, 128 }
 0x47b   :  { %p1260_p5 = scmp.ne.s32.totalorder %s1577_s9, %s1259_s5  ;;  %p1263_p6 = scmp.lt.u32.totalorder %s1259_s5, %s1577_s9 }
 0x47d   :  { %p1265_p7 = pnand %p1263_p6, %p1260_p5 }
 0x47f   :  { %1268 = shalt.err (!%p1265_p7)
}
 0x480   :  { %826 = dma.vmem_to_hbm [thread:$0]  %s824_s25, 128, %s1577_s9, [#allocation3]  }
 0x481   :  { %1269 = dma.done.wait [#allocation3], 128  }
 0x482   :  { %1270 = vsyncadd [#allocation3], 4294967168 }
 0x483   :  { %830 = vsyncpa [#allocation3], 1 }

</bundles_post_ra>
